<compile_context>
chip_gen: v7x
topology: tpu7x:2x2x1
jax: 0.10.0
libtpu: 0.0.40
codegen_flags: <defaults>
</compile_context>

<pallas_src>
import jax
import jax.numpy as jnp
from jax import lax
from jax.experimental import pallas as pl
from jax.experimental.pallas import tpu as pltpu


def _round_up(n, m):
    return ((n + m - 1) // m) * m


def resnet_gated_kernel(g_ref, x_ref, w1_ref, b1_ref, w2_ref, b2_ref, o_ref):
    """g: SMEM (L,) f32 = sigmoid(gates); x/o: (Bp, Dp) f32 VMEM;
    w1: (L, Dp, Hp) bf16; b1: (L, 1, Hp) f32; w2: (L, Hp, Dp) bf16; b2: (L, 1, Dp) f32."""
    num_layers = w1_ref.shape[0]
    x0 = x_ref[...]                                   # (Bp, Dp) f32, loaded once

    def layer(l, x):
        g = g_ref[l]                                  # SMEM scalar sigmoid(gate[l])
        xr = jnp.maximum(x, 0.0)                      # x = relu(x)     (f32, VPU)

        # layer(x) = Linear2(Dropout(ReLU(Linear1(x)))) — matmuls in bf16 on the
        # MXU, accumulation in f32.
        h = jnp.dot(xr.astype(jnp.bfloat16), w1_ref[l],
                    preferred_element_type=jnp.float32) + b1_ref[l]
        h = jnp.maximum(h, 0.0)
        # TODO(synk): nn.Dropout has no deterministic Pallas equivalent in
        # training mode; identity here (inference semantics / p_dropout = 0).
        y = jnp.dot(h.astype(jnp.bfloat16), w2_ref[l],
                    preferred_element_type=jnp.float32) + b2_ref[l]

        # x = sigmoid(g) * layer(x) + (1 - sigmoid(g)) * x  ==  xr + g*(y - xr)
        return xr + g * (y - xr)

    o_ref[...] = lax.fori_loop(0, num_layers, layer, x0, unroll=True)


def resnet_gated_forward(x, gates, w1, b1, w2, b2):
    """x: (B, D); gates: (L,); w1: (L, D, H); b1: (L, H); w2: (L, H, D); b2: (L, D).

    Weights are already stored transposed w.r.t. torch's nn.Linear (out, in)
    layout so the in-kernel matmul is simply x @ W.
    """
    L, D, H = w1.shape
    B = x.shape[0]

    Bp = _round_up(max(B, 8), 8)        # sublane-aligned rows
    Dp = _round_up(max(D, 128), 128)    # lane-dense feature dims
    Hp = _round_up(max(H, 128), 128)

    # One-time host-side pad + dtype cast (in a real model these would be
    # pre-materialized once, not per call).
    xp = jnp.zeros((Bp, Dp), jnp.float32).at[:B, :D].set(x.astype(jnp.float32))
    w1p = jnp.zeros((L, Dp, Hp), jnp.bfloat16).at[:, :D, :H].set(w1.astype(jnp.bfloat16))
    w2p = jnp.zeros((L, Hp, Dp), jnp.bfloat16).at[:, :H, :D].set(w2.astype(jnp.bfloat16))
    b1p = jnp.zeros((L, 1, Hp), jnp.float32).at[:, 0, :H].set(b1.astype(jnp.float32))
    b2p = jnp.zeros((L, 1, Dp), jnp.float32).at[:, 0, :D].set(b2.astype(jnp.float32))
    g = jax.nn.sigmoid(gates).astype(jnp.float32)     # (L,) scalars -> SMEM

    out_p = pl.pallas_call(
        resnet_gated_kernel,
        out_shape=jax.ShapeDtypeStruct((Bp, Dp), jnp.float32),
        in_specs=[
            pl.BlockSpec(memory_space=pltpu.MemorySpace.SMEM),   # sigmoid(gates)
            pl.BlockSpec(memory_space=pltpu.MemorySpace.VMEM),   # x  (whole block)
            pl.BlockSpec(memory_space=pltpu.MemorySpace.VMEM),   # w1 (all layers)
            pl.BlockSpec(memory_space=pltpu.MemorySpace.VMEM),   # b1
            pl.BlockSpec(memory_space=pltpu.MemorySpace.VMEM),   # w2
            pl.BlockSpec(memory_space=pltpu.MemorySpace.VMEM),   # b2
        ],
        out_specs=pl.BlockSpec(memory_space=pltpu.MemorySpace.VMEM),
    )(g, xp, w1p, b1p, w2p, b2p)

    return out_p[:B, :D]


def resnet_gated_ref(x, gates, w1, b1, w2, b2, matmul_dtype=jnp.float32):
    """Pure-JAX reference matching the PyTorch forward (dropout = identity).

    matmul_dtype=bfloat16 mirrors the kernel's MXU precision exactly."""
    rg = jax.nn.sigmoid(gates).astype(jnp.float32)
    x = x.astype(jnp.float32)
    for i in range(w1.shape[0]):
        xr = jnp.maximum(x, 0.0)
        h = jnp.dot(xr.astype(matmul_dtype), w1[i].astype(matmul_dtype),
                    preferred_element_type=jnp.float32) + b1[i]
        h = jnp.maximum(h, 0.0)
        y = jnp.dot(h.astype(matmul_dtype), w2[i].astype(matmul_dtype),
                    preferred_element_type=jnp.float32) + b2[i]
        x = xr + rg[i] * (y - xr)
    return x


def make_params(key, init_dim, hidden_dim, layers):
    """Deterministic synthetic init mirroring the module's __init__ shapes.

    torch Linear(init_dim, hidden_dim).weight is (H, D) xavier-uniform; we
    store the transpose (D, H) for x @ W.  Biases are filled with 0.01 as in
    init_weights.  `gates` gets a deterministic normal init.
    """
    k_g, k_w1, k_w2 = jax.random.split(key, 3)
    bound = (6.0 / (init_dim + hidden_dim)) ** 0.5
    w1 = jax.random.uniform(k_w1, (layers, init_dim, hidden_dim),
                            minval=-bound, maxval=bound, dtype=jnp.float32)
    w2 = jax.random.uniform(k_w2, (layers, hidden_dim, init_dim),
                            minval=-bound, maxval=bound, dtype=jnp.float32)
    b1 = jnp.full((layers, hidden_dim), 0.01, dtype=jnp.float32)
    b2 = jnp.full((layers, init_dim), 0.01, dtype=jnp.float32)
    gates = jax.random.normal(k_g, (layers,), dtype=jnp.float32)
    return gates, w1, b1, w2, b2


if __name__ == "__main__":
    B, INIT_DIM, HIDDEN_DIM, LAYERS = 8, 32, 64, 3
    P_DROPOUT = 0.0  # dropout is identity (see TODO in kernel)

    key = jax.random.PRNGKey(0)
    k_x, k_p = jax.random.split(key)
    x = jax.random.normal(k_x, (B, INIT_DIM), dtype=jnp.float32)
    gates, w1, b1, w2, b2 = make_params(k_p, INIT_DIM, HIDDEN_DIM, LAYERS)

    out = resnet_gated_forward(x, gates, w1, b1, w2, b2)
    out = jax.block_until_ready(out)
    assert out.shape == (B, INIT_DIM)

    # Exact-precision reference (bf16 matmuls, f32 accumulate — same as kernel).
    ref_bf16 = resnet_gated_ref(x, gates, w1, b1, w2, b2, matmul_dtype=jnp.bfloat16)
    assert jnp.allclose(out, ref_bf16, atol=2e-3, rtol=2e-3), "mismatch vs bf16-matched reference"

    # Sanity check against full-f32 reference (bf16 MXU quantization only).
    ref_f32 = resnet_gated_ref(x, gates, w1, b1, w2, b2, matmul_dtype=jnp.float32)
    assert jnp.allclose(out, ref_f32, atol=5e-2, rtol=5e-2), "mismatch vs f32 reference"

    print("KERNEL_OK")
</pallas_src>

<mosaic_0001>
module attributes {stable_mosaic.version = 11 : i64} {
  func.func @resnet_gated_kernel(%arg0: memref<3xf32, #tpu.memory_space<smem>>, %arg1: memref<8x128xf32, #tpu.memory_space<vmem>>, %arg2: memref<3x128x128xbf16, #tpu.memory_space<vmem>>, %arg3: memref<3x1x128xf32, #tpu.memory_space<vmem>>, %arg4: memref<3x128x128xbf16, #tpu.memory_space<vmem>>, %arg5: memref<3x1x128xf32, #tpu.memory_space<vmem>>, %arg6: memref<8x128xf32, #tpu.memory_space<vmem>>) attributes {dimension_semantics = [], scalar_prefetch = 0 : i64, scratch_operands = 0 : i64, tpu.core_type = #tpu.core_type<tc>} {
    %c0 = arith.constant 0 : index
    %c0_0 = arith.constant 0 : index
    %0 = vector.load %arg1[%c0, %c0_0] : memref<8x128xf32, #tpu.memory_space<vmem>>, vector<8x128xf32>
    %c0_i32 = arith.constant 0 : i32
    %1 = arith.index_cast %c0_i32 : i32 to index
    %2 = memref.load %arg0[%1] : memref<3xf32, #tpu.memory_space<smem>>
    %cst = arith.constant 0.000000e+00 : f32
    %3 = vector.broadcast %cst : f32 to vector<8x128xf32>
    %4 = arith.maximumf %0, %3 : vector<8x128xf32>
    %5 = arith.truncf %4 : vector<8x128xf32> to vector<8x128xbf16>
    %6 = arith.index_cast %c0_i32 : i32 to index
    %c0_1 = arith.constant 0 : index
    %c0_2 = arith.constant 0 : index
    %7 = vector.load %arg2[%6, %c0_1, %c0_2] : memref<3x128x128xbf16, #tpu.memory_space<vmem>>, vector<1x128x128xbf16>
    %8 = vector.shape_cast %7 : vector<1x128x128xbf16> to vector<128x128xbf16>
    %cst_3 = arith.constant dense<0.000000e+00> : vector<8x128xf32>
    %9 = tpu.matmul %5, %8, %cst_3 {dimension_numbers = #tpu.dot_dimension_numbers<[1], [0], [0], [1], [0, 0, 1, 1], [], []>} : vector<8x128xbf16>, vector<128x128xbf16>, vector<8x128xf32> -> vector<8x128xf32>
    %10 = arith.index_cast %c0_i32 : i32 to index
    %c0_4 = arith.constant 0 : index
    %c0_5 = arith.constant 0 : index
    %11 = vector.load %arg3[%10, %c0_4, %c0_5] : memref<3x1x128xf32, #tpu.memory_space<vmem>>, vector<1x1x128xf32>
    %12 = vector.shape_cast %11 : vector<1x1x128xf32> to vector<1x128xf32>
    %13 = vector.broadcast %12 : vector<1x128xf32> to vector<8x128xf32>
    %14 = arith.addf %9, %13 : vector<8x128xf32>
    %cst_6 = arith.constant 0.000000e+00 : f32
    %15 = vector.broadcast %cst_6 : f32 to vector<8x128xf32>
    %16 = arith.maximumf %14, %15 : vector<8x128xf32>
    %17 = arith.truncf %16 : vector<8x128xf32> to vector<8x128xbf16>
    %18 = arith.index_cast %c0_i32 : i32 to index
    %c0_7 = arith.constant 0 : index
    %c0_8 = arith.constant 0 : index
    %19 = vector.load %arg4[%18, %c0_7, %c0_8] : memref<3x128x128xbf16, #tpu.memory_space<vmem>>, vector<1x128x128xbf16>
    %20 = vector.shape_cast %19 : vector<1x128x128xbf16> to vector<128x128xbf16>
    %cst_9 = arith.constant dense<0.000000e+00> : vector<8x128xf32>
    %21 = tpu.matmul %17, %20, %cst_9 {dimension_numbers = #tpu.dot_dimension_numbers<[1], [0], [0], [1], [0, 0, 1, 1], [], []>} : vector<8x128xbf16>, vector<128x128xbf16>, vector<8x128xf32> -> vector<8x128xf32>
    %22 = arith.index_cast %c0_i32 : i32 to index
    %c0_10 = arith.constant 0 : index
    %c0_11 = arith.constant 0 : index
    %23 = vector.load %arg5[%22, %c0_10, %c0_11] : memref<3x1x128xf32, #tpu.memory_space<vmem>>, vector<1x1x128xf32>
    %24 = vector.shape_cast %23 : vector<1x1x128xf32> to vector<1x128xf32>
    %25 = vector.broadcast %24 : vector<1x128xf32> to vector<8x128xf32>
    %26 = arith.addf %21, %25 : vector<8x128xf32>
    %27 = arith.subf %26, %4 : vector<8x128xf32>
    %28 = vector.broadcast %2 : f32 to vector<8x128xf32>
    %29 = arith.mulf %28, %27 : vector<8x128xf32>
    %30 = arith.addf %4, %29 : vector<8x128xf32>
    %c1_i32 = arith.constant 1 : i32
    %31 = arith.index_cast %c1_i32 : i32 to index
    %32 = memref.load %arg0[%31] : memref<3xf32, #tpu.memory_space<smem>>
    %cst_12 = arith.constant 0.000000e+00 : f32
    %33 = vector.broadcast %cst_12 : f32 to vector<8x128xf32>
    %34 = arith.maximumf %30, %33 : vector<8x128xf32>
    %35 = arith.truncf %34 : vector<8x128xf32> to vector<8x128xbf16>
    %36 = arith.index_cast %c1_i32 : i32 to index
    %c0_13 = arith.constant 0 : index
    %c0_14 = arith.constant 0 : index
    %37 = vector.load %arg2[%36, %c0_13, %c0_14] : memref<3x128x128xbf16, #tpu.memory_space<vmem>>, vector<1x128x128xbf16>
    %38 = vector.shape_cast %37 : vector<1x128x128xbf16> to vector<128x128xbf16>
    %cst_15 = arith.constant dense<0.000000e+00> : vector<8x128xf32>
    %39 = tpu.matmul %35, %38, %cst_15 {dimension_numbers = #tpu.dot_dimension_numbers<[1], [0], [0], [1], [0, 0, 1, 1], [], []>} : vector<8x128xbf16>, vector<128x128xbf16>, vector<8x128xf32> -> vector<8x128xf32>
    %40 = arith.index_cast %c1_i32 : i32 to index
    %c0_16 = arith.constant 0 : index
    %c0_17 = arith.constant 0 : index
    %41 = vector.load %arg3[%40, %c0_16, %c0_17] : memref<3x1x128xf32, #tpu.memory_space<vmem>>, vector<1x1x128xf32>
    %42 = vector.shape_cast %41 : vector<1x1x128xf32> to vector<1x128xf32>
    %43 = vector.broadcast %42 : vector<1x128xf32> to vector<8x128xf32>
    %44 = arith.addf %39, %43 : vector<8x128xf32>
    %cst_18 = arith.constant 0.000000e+00 : f32
    %45 = vector.broadcast %cst_18 : f32 to vector<8x128xf32>
    %46 = arith.maximumf %44, %45 : vector<8x128xf32>
    %47 = arith.truncf %46 : vector<8x128xf32> to vector<8x128xbf16>
    %48 = arith.index_cast %c1_i32 : i32 to index
    %c0_19 = arith.constant 0 : index
    %c0_20 = arith.constant 0 : index
    %49 = vector.load %arg4[%48, %c0_19, %c0_20] : memref<3x128x128xbf16, #tpu.memory_space<vmem>>, vector<1x128x128xbf16>
    %50 = vector.shape_cast %49 : vector<1x128x128xbf16> to vector<128x128xbf16>
    %cst_21 = arith.constant dense<0.000000e+00> : vector<8x128xf32>
    %51 = tpu.matmul %47, %50, %cst_21 {dimension_numbers = #tpu.dot_dimension_numbers<[1], [0], [0], [1], [0, 0, 1, 1], [], []>} : vector<8x128xbf16>, vector<128x128xbf16>, vector<8x128xf32> -> vector<8x128xf32>
    %52 = arith.index_cast %c1_i32 : i32 to index
    %c0_22 = arith.constant 0 : index
    %c0_23 = arith.constant 0 : index
    %53 = vector.load %arg5[%52, %c0_22, %c0_23] : memref<3x1x128xf32, #tpu.memory_space<vmem>>, vector<1x1x128xf32>
    %54 = vector.shape_cast %53 : vector<1x1x128xf32> to vector<1x128xf32>
    %55 = vector.broadcast %54 : vector<1x128xf32> to vector<8x128xf32>
    %56 = arith.addf %51, %55 : vector<8x128xf32>
    %57 = arith.subf %56, %34 : vector<8x128xf32>
    %58 = vector.broadcast %32 : f32 to vector<8x128xf32>
    %59 = arith.mulf %58, %57 : vector<8x128xf32>
    %60 = arith.addf %34, %59 : vector<8x128xf32>
    %c2_i32 = arith.constant 2 : i32
    %61 = arith.index_cast %c2_i32 : i32 to index
    %62 = memref.load %arg0[%61] : memref<3xf32, #tpu.memory_space<smem>>
    %cst_24 = arith.constant 0.000000e+00 : f32
    %63 = vector.broadcast %cst_24 : f32 to vector<8x128xf32>
    %64 = arith.maximumf %60, %63 : vector<8x128xf32>
    %65 = arith.truncf %64 : vector<8x128xf32> to vector<8x128xbf16>
    %66 = arith.index_cast %c2_i32 : i32 to index
    %c0_25 = arith.constant 0 : index
    %c0_26 = arith.constant 0 : index
    %67 = vector.load %arg2[%66, %c0_25, %c0_26] : memref<3x128x128xbf16, #tpu.memory_space<vmem>>, vector<1x128x128xbf16>
    %68 = vector.shape_cast %67 : vector<1x128x128xbf16> to vector<128x128xbf16>
    %cst_27 = arith.constant dense<0.000000e+00> : vector<8x128xf32>
    %69 = tpu.matmul %65, %68, %cst_27 {dimension_numbers = #tpu.dot_dimension_numbers<[1], [0], [0], [1], [0, 0, 1, 1], [], []>} : vector<8x128xbf16>, vector<128x128xbf16>, vector<8x128xf32> -> vector<8x128xf32>
    %70 = arith.index_cast %c2_i32 : i32 to index
    %c0_28 = arith.constant 0 : index
    %c0_29 = arith.constant 0 : index
    %71 = vector.load %arg3[%70, %c0_28, %c0_29] : memref<3x1x128xf32, #tpu.memory_space<vmem>>, vector<1x1x128xf32>
    %72 = vector.shape_cast %71 : vector<1x1x128xf32> to vector<1x128xf32>
    %73 = vector.broadcast %72 : vector<1x128xf32> to vector<8x128xf32>
    %74 = arith.addf %69, %73 : vector<8x128xf32>
    %cst_30 = arith.constant 0.000000e+00 : f32
    %75 = vector.broadcast %cst_30 : f32 to vector<8x128xf32>
    %76 = arith.maximumf %74, %75 : vector<8x128xf32>
    %77 = arith.truncf %76 : vector<8x128xf32> to vector<8x128xbf16>
    %78 = arith.index_cast %c2_i32 : i32 to index
    %c0_31 = arith.constant 0 : index
    %c0_32 = arith.constant 0 : index
    %79 = vector.load %arg4[%78, %c0_31, %c0_32] : memref<3x128x128xbf16, #tpu.memory_space<vmem>>, vector<1x128x128xbf16>
    %80 = vector.shape_cast %79 : vector<1x128x128xbf16> to vector<128x128xbf16>
    %cst_33 = arith.constant dense<0.000000e+00> : vector<8x128xf32>
    %81 = tpu.matmul %77, %80, %cst_33 {dimension_numbers = #tpu.dot_dimension_numbers<[1], [0], [0], [1], [0, 0, 1, 1], [], []>} : vector<8x128xbf16>, vector<128x128xbf16>, vector<8x128xf32> -> vector<8x128xf32>
    %82 = arith.index_cast %c2_i32 : i32 to index
    %c0_34 = arith.constant 0 : index
    %c0_35 = arith.constant 0 : index
    %83 = vector.load %arg5[%82, %c0_34, %c0_35] : memref<3x1x128xf32, #tpu.memory_space<vmem>>, vector<1x1x128xf32>
    %84 = vector.shape_cast %83 : vector<1x1x128xf32> to vector<1x128xf32>
    %85 = vector.broadcast %84 : vector<1x128xf32> to vector<8x128xf32>
    %86 = arith.addf %81, %85 : vector<8x128xf32>
    %87 = arith.subf %86, %64 : vector<8x128xf32>
    %88 = vector.broadcast %62 : f32 to vector<8x128xf32>
    %89 = arith.mulf %88, %87 : vector<8x128xf32>
    %90 = arith.addf %64, %89 : vector<8x128xf32>
    %c3_i32 = arith.constant 3 : i32
    %c0_36 = arith.constant 0 : index
    %c0_37 = arith.constant 0 : index
    %91 = vector.load %arg6[%c0_36, %c0_37] : memref<8x128xf32, #tpu.memory_space<vmem>>, vector<8x128xf32>
    tpu.vector_store %arg6[%c0_36, %c0_37], %90 {strides = array<i32>} : memref<8x128xf32, #tpu.memory_space<vmem>>, vector<8x128xf32>,
    return
  }
}

</mosaic_0001>

<bundles_post_ra>
// kernel: tpu_custom_call.1
= control target key start
LH: loop header
LB: loop body
LE: loop exit
PB: predicated region body
PF: predicated region fallthrough
CT: control target
= control target key end

     0   :  { %11 = vsyncpa [#allocation5], 0  ;;  %s1399_s0 = inlined_call_operand.hbm [shape: f32[3], index: 0, kind: input, shape index: {}]   ;;  %s1400_s1 = inlined_call_operand.hbm [shape: f32[8,128], index: 1, kind: input, shape index: {}]   ;;  %s1401_s2 = inlined_call_operand.hbm [shape: bf16[3,128,128], index: 2, kind: input, shape index: {}]   ;;  %s1402_s3 = inlined_call_operand.vmem [shape: f32[3,1,128], index: 3, kind: input, shape index: {}]   ;;  %s1403_s4 = inlined_call_operand.hbm [shape: bf16[3,128,128], index: 4, kind: input, shape index: {}]   ;;  %s1404_s5 = inlined_call_operand.vmem [shape: f32[3,1,128], index: 5, kind: input, shape index: {}]   ;;  %s1405_s6 = inlined_call_operand.hbm [shape: f32[8,128], index: 6, kind: output, shape index: {}]  }
   0x1   :  { %12 = vsyncpa [#allocation3], 0 }
   0x2   :  { %13 = vsyncpa [#allocation8], 0 }
   0x3   :  { %14 = vsyncpa [#allocation4], 0  ;;  %s1192_s21 = smov [#allocation7]   ;;  %s1086_s25 = scalar_lea.hbm %s1401_s2, 3072 }
   0x4   :  { %s38_s22 = sshll.u32 %s1192_s21, 4  ;;  %p1087_p0 = scmp.ne.s32.totalorder %s1401_s2, %s1086_s25  ;;  %s39_s22 = int_to_ptr.vmem [resolvable:$true] %s38_s22 }
   0x5   :  { %p1090_p1 = scmp.lt.u32.totalorder %s1086_s25, %s1401_s2 }
   0x7   :  { %p1092_p2 = pnand %p1090_p1, %p1087_p0 }
   0x9   :  { %1095 = shalt.err (!%p1092_p2)
}
   0xa   :  { %s1096_s30 = scalar_lea.vmem %s39_s22, 3072  ;;  %p1101_p4 = scmp.lt.s32.totalorder %s39_s22, %s39_s22 }
   0xb   :  { %p1097_p3 = scmp.ne.s32.totalorder %s39_s22, %s1096_s30  ;;  %p1102_p5 = scmp.lt.s32.totalorder %s1096_s30, %s1096_s30 }
   0xd   :  { %p1103_p6 = por %p1102_p5, %p1101_p4 }
   0xf   :  { %p1104_p7 = pnand %p1103_p6, %p1097_p3 }
  0x11   :  { %1107 = shalt.err (!%p1104_p7)
}
  0x12   :  { %s1193_s7 = smov 64   ;;  %s1194_s8 = smov 4  }
  0x13   :  { %44 = dma.hbm_to_vmem [thread:$0]  %s1401_s2, 3072, %s39_s22, [#allocation8], %s1193_s7, %s1193_s7, %s1194_s8  }
  0x14   :  { %s1108_s13 = scalar_lea.hbm %s1399_s0, 16 }
  0x15   :  { %p1109_p8 = scmp.ne.s32.totalorder %s1399_s0, %s1108_s13  ;;  %p1112_p9 = scmp.lt.u32.totalorder %s1108_s13, %s1399_s0 }
  0x17   :  { %p1114_p10 = pnand %p1112_p9, %p1109_p8 }
  0x19   :  { %1117 = shalt.err (!%p1114_p10)
}
  0x1a   :  { %s1195_s18 = smov [#allocation2]   ;;  %s1196_s2 = smov [#allocation6]  }
  0x1b   :  { %22 = dma.hbm_to_smem %s1399_s0, 16, %s1195_s18, [#allocation5]  }
  0x1c   :  { %s29_s21 = sshll.u32 %s1196_s2, 4  ;;  %s1197_s22 = smov [#allocation9]   ;;  %s30_s21 = int_to_ptr.vmem [resolvable:$true] %s29_s21 }
  0x1d   :  { %s52_s23 = sshll.u32 %s1197_s22, 4  ;;  %s1118_s26 = scalar_lea.hbm %s1400_s1, 128  ;;  %s1263_s23 = int_to_ptr.vmem [resolvable:$true] %s52_s23 }
  0x1e   :  { %p1119_p11 = scmp.ne.s32.totalorder %s1400_s1, %s1118_s26  ;;  %p1122_p12 = scmp.lt.u32.totalorder %s1118_s26, %s1400_s1 }
  0x20   :  { %p1124_p13 = pnand %p1122_p12, %p1119_p11 }
  0x22   :  { %1127 = shalt.err (!%p1124_p13)
}
  0x23   :  { %s1128_s0 = scalar_lea.vmem %s30_s21, 128  ;;  %p1133_p1 = scmp.lt.s32.totalorder %s30_s21, %s30_s21 }
  0x24   :  { %p1129_p0 = scmp.ne.s32.totalorder %s30_s21, %s1128_s0  ;;  %p1134_p2 = scmp.lt.s32.totalorder %s1128_s0, %s1128_s0 }
  0x26   :  { %p1135_p3 = por %p1134_p2, %p1133_p1 }
  0x28   :  { %p1136_p4 = pnand %p1135_p3, %p1129_p0 }
  0x2a   :  { %1139 = shalt.err (!%p1136_p4)
}
  0x2b   :  { %32 = dma.hbm_to_vmem [thread:$0]  %s1400_s1, 128, %s30_s21, [#allocation3]  }
  0x2c   :  { %s1140_s13 = scalar_lea.hbm %s1403_s4, 3072 }
  0x2d   :  { %p1141_p5 = scmp.ne.s32.totalorder %s1403_s4, %s1140_s13  ;;  %p1144_p6 = scmp.lt.u32.totalorder %s1140_s13, %s1403_s4 }
  0x2f   :  { %p1146_p7 = pnand %p1144_p6, %p1141_p5 }
  0x31   :  { %1149 = shalt.err (!%p1146_p7)
}
  0x32   :  { %s1150_s18 = scalar_lea.vmem %s1263_s23, 3072  ;;  %p1155_p9 = scmp.lt.s32.totalorder %s1263_s23, %s1263_s23 }
  0x33   :  { %p1151_p8 = scmp.ne.s32.totalorder %s1263_s23, %s1150_s18  ;;  %p1156_p10 = scmp.lt.s32.totalorder %s1150_s18, %s1150_s18 }
  0x35   :  { %p1157_p11 = por %p1156_p10, %p1155_p9 }
  0x37   :  { %p1158_p12 = pnand %p1157_p11, %p1151_p8 }
  0x39   :  { %1161 = shalt.err (!%p1158_p12)
}
  0x3a   :  { %58 = dma.hbm_to_vmem [thread:$0]  %s1403_s4, 3072, %s1263_s23, [#allocation8], %s1193_s7, %s1193_s7, %s1194_s8  }
  0x3b   :  { %1184 = dma.done.wait [#allocation5], 16  }
  0x3c   :  { %1185 = vsyncadd [#allocation5], 4294967280 }
  0x3d   :  { %1186 = dma.done.wait [#allocation3], 128  }
  0x3e   :  { %1187 = vsyncadd [#allocation3], 4294967168 }
  0x3f   :  { %1188 = dma.done.wait [#allocation8], 6144  }
  0x40   :  { %1189 = vsyncadd [#allocation8], 4294961152 }
  0x41   :  { %73 = sfence }
  0x42   :  { %v1038_v0 = vld [vmem:[#allocation7] sm:$0xff]   ;;  %v1198_v1 = vmov 0.0   ;;  %v1039_v2 = vld [vmem:[#allocation7 + $0x8] sm:$0xff]   ;;  %vm1199_vm0 = vmmov 0   ;;  %v1040_v3 = vld [vmem:[#allocation7 + $0x10] sm:$0xff]   ;;  %s76_s8 = sld [smem:[#allocation2]] }
  0x43   :  { %909 = vmatprep.subr.bf16.mxu0 %v1198_v1  ;;  %929 = vmatprep.subr.bf16.mxu1 %v1198_v1  ;;  %v1041_v4 = vld [vmem:[#allocation7 + $0x18] sm:$0xff]   ;;  %v1046_v5 = vld [vmem:[#allocation9] sm:$0xff]   ;;  %v1047_v7 = vld [vmem:[#allocation9 + $0x8] sm:$0xff]   ;;  %s813_s23 = sld [smem:[#allocation2 + $0x1]]  ;;  %s834_s28 = sld [smem:[#allocation2 + $0x2]] }
  0x44   :  { %910 = vmatpush3.bf16.msra.mxu0 %v1038_v0  ;;  %925 = vmatprep.mubr.msk.bf16.mxu0 %vm1199_vm0, %v1198_v1  ;;  %v75_v6 = vld [vmem:[#allocation6] sm:$0xff]  ;;  %v1042_v8 = vld [vmem:[#allocation7 + $0x20] sm:$0xff]   ;;  %v1048_v10 = vld [vmem:[#allocation9 + $0x10] sm:$0xff]  }
  0x45   :  { %911 = vmatprep.subr.bf16.mxu0 %v1198_v1  ;;  %945 = vmatprep.mubr.msk.bf16.mxu1 %vm1199_vm0, %v1198_v1  ;;  %v1307_v9 = vmax.f32 %v75_v6, 0.0  ;;  %v1043_v11 = vld [vmem:[#allocation7 + $0x28] sm:$0xff]   ;;  %v1049_v12 = vld [vmem:[#allocation9 + $0x18] sm:$0xff]   ;;  %v1044_v13 = vld [vmem:[#allocation7 + $0x30] sm:$0xff]  }
  0x46   :  { %930 = vmatpush3.bf16.msra.mxu1 %v1046_v5  ;;  %v1050_v14 = vld [vmem:[#allocation9 + $0x20] sm:$0xff]   ;;  %v1045_v15 = vld [vmem:[#allocation7 + $0x38] sm:$0xff]   ;;  %v1051_v16 = vld [vmem:[#allocation9 + $0x28] sm:$0xff]  }
  0x47   :  { %931 = vmatprep.subr.bf16.mxu1 %v1198_v1  ;;  %v78_v17 = vpack.c.bf16 %v1307_v9, %v1307_v9  ;;  %v1052_v18 = vld [vmem:[#allocation9 + $0x30] sm:$0xff]   ;;  %v1053_v19 = vld [vmem:[#allocation9 + $0x38] sm:$0xff]   ;;  %v1054_v20 = vld [vmem:[#allocation7 + $0x40] sm:$0xff]  }
  0x48   :  { %912 = vmatpush3.bf16.msra.mxu0 %v1039_v2  ;;  %v1055_v21 = vld [vmem:[#allocation7 + $0x48] sm:$0xff]   ;;  %v1056_v22 = vld [vmem:[#allocation7 + $0x50] sm:$0xff]   ;;  %v1057_v23 = vld [vmem:[#allocation7 + $0x58] sm:$0xff]   ;;  %v304_v46 = vstv %s76_s8 }
  0x49   :  { %913 = vmatprep.subr.bf16.mxu0 %v1198_v1  ;;  %v1058_v24 = vld [vmem:[#allocation7 + $0x60] sm:$0xff]   ;;  %v795_v25 = vld [vmem:[%s1402_s3] ss:$0 sm:$0xff]  ;;  %v1060_v34 = vld [vmem:[#allocation7 + $0x70] sm:$0xff]  }
  0x4a   :  { %932 = vmatpush3.bf16.msra.mxu1 %v1047_v7  ;;  %v1059_v33 = vld [vmem:[#allocation7 + $0x68] sm:$0xff]   ;;  %v1061_v35 = vld [vmem:[#allocation7 + $0x78] sm:$0xff]   ;;  %v1062_v36 = vld [vmem:[#allocation9 + $0x40] sm:$0xff]  }
  0x4b   :  { %933 = vmatprep.subr.bf16.mxu1 %v1198_v1  ;;  %v1063_v37 = vld [vmem:[#allocation9 + $0x48] sm:$0xff]   ;;  %v1064_v38 = vld [vmem:[#allocation9 + $0x50] sm:$0xff]   ;;  %v1065_v39 = vld [vmem:[#allocation9 + $0x58] sm:$0xff]  }
  0x4c   :  { %914 = vmatpush3.bf16.msra.mxu0 %v1040_v3  ;;  %v1066_v40 = vld [vmem:[#allocation9 + $0x60] sm:$0xff]   ;;  %v1067_v41 = vld [vmem:[#allocation9 + $0x68] sm:$0xff]   ;;  %v1068_v54 = vld [vmem:[#allocation9 + $0x70] sm:$0xff]  }
  0x4d   :  { %915 = vmatprep.subr.bf16.mxu0 %v1198_v1  ;;  %v804_v42 = vld [vmem:[%s1404_s5] ss:$0 sm:$0xff]  ;;  %v1069_v55 = vld [vmem:[#allocation9 + $0x78] sm:$0xff]   ;;  %v1070_v56 = vld [vmem:[#allocation7 + $0x80] sm:$0xff]  }
  0x4e   :  { %934 = vmatpush3.bf16.msra.mxu1 %v1048_v10  ;;  %v1071_v57 = vld [vmem:[#allocation7 + $0x88] sm:$0xff]   ;;  %v1072_v58 = vld [vmem:[#allocation7 + $0x90] sm:$0xff]   ;;  %v1073_v59 = vld [vmem:[#allocation7 + $0x98] sm:$0xff]  }
  0x4f   :  { %935 = vmatprep.subr.bf16.mxu1 %v1198_v1  ;;  %v1074_v60 = vld [vmem:[#allocation7 + $0xa0] sm:$0xff]   ;;  %v815_v61 = vld [vmem:[%s1402_s3 + $0x1] ss:$0 sm:$0xff]  ;;  %v1076_v7 = vld [vmem:[#allocation7 + $0xb0] sm:$0xff]  }
  0x50   :  { %916 = vmatpush3.bf16.msra.mxu0 %v1041_v4  ;;  %v1075_v6 = vld [vmem:[#allocation7 + $0xa8] sm:$0xff]  }
  0x51   :  { %917 = vmatprep.subr.bf16.mxu0 %v1198_v1  ;;  %v1079_v10 = vld [vmem:[#allocation9 + $0x88] sm:$0xff]  }
  0x52   :  { %936 = vmatpush3.bf16.msra.mxu1 %v1049_v12  ;;  %v1081_v12 = vld [vmem:[#allocation9 + $0x98] sm:$0xff]  }
  0x53   :  { %937 = vmatprep.subr.bf16.mxu1 %v1198_v1 }
  0x54   :  { %918 = vmatpush3.bf16.msra.mxu0 %v1042_v8  ;;  %v1077_v8 = vld [vmem:[#allocation7 + $0xb8] sm:$0xff]  }
  0x55   :  { %919 = vmatprep.subr.bf16.mxu0 %v1198_v1 }
  0x56   :  { %938 = vmatpush3.bf16.msra.mxu1 %v1050_v14  ;;  %v1083_v14 = vld [vmem:[#allocation9 + $0xa8] sm:$0xff]  }
  0x57   :  { %939 = vmatprep.subr.bf16.mxu1 %v1198_v1 }
  0x58   :  { %920 = vmatpush3.bf16.msra.mxu0 %v1043_v11  ;;  %v1080_v11 = vld [vmem:[#allocation9 + $0x90] sm:$0xff]  }
  0x59   :  { %921 = vmatprep.subr.bf16.mxu0 %v1198_v1 }
  0x5a   :  { %940 = vmatpush3.bf16.msra.mxu1 %v1051_v16 }
  0x5b   :  { %941 = vmatprep.subr.bf16.mxu1 %v1198_v1 }
  0x5c   :  { %922 = vmatpush3.bf16.msra.mxu0 %v1044_v13  ;;  %v1082_v13 = vld [vmem:[#allocation9 + $0xa0] sm:$0xff]  }
  0x5d   :  { %923 = vmatprep.subr.bf16.mxu0 %v1198_v1 }
  0x5e   :  { %942 = vmatpush3.bf16.msra.mxu1 %v1052_v18 }
  0x5f   :  { %943 = vmatprep.subr.bf16.mxu1 %v1198_v1 }
  0x60   :  { %924 = vmatpush3.bf16.msra.mxu0 %v1045_v15  ;;  %v825_v15 = vld [vmem:[%s1404_s5 + $0x1] ss:$0 sm:$0xff] }
  0x61   :  { %949 = vmatprep.subr.bf16.mxu0 %v1198_v1 }
  0x62   :  { %944 = vmatpush3.bf16.msra.mxu1 %v1053_v19  ;;  %v539_v19 = vstv %s813_s23 }
  0x63   :  { %926 = vmatmul.mubr.bf16.vlgmr.msra.gmra.mrb[0].mxu0 %v78_v17  ;;  %969 = vmatprep.subr.bf16.mxu1 %v1198_v1 }
  0x64   :  { %965 = vmatprep.mubr.msk.bf16.mxu0 %vm1199_vm0, %v1198_v1  ;;  %950 = vmatpush3.bf16.msra.mxu0 %v1054_v20 }
  0x65   :  { %951 = vmatprep.subr.bf16.mxu0 %v1198_v1 }
  0x68   :  { %952 = vmatpush3.bf16.msra.mxu0 %v1055_v21 }
  0x69   :  { %953 = vmatprep.subr.bf16.mxu0 %v1198_v1 }
  0x6c   :  { %954 = vmatpush3.bf16.msra.mxu0 %v1056_v22 }
  0x6d   :  { %955 = vmatprep.subr.bf16.mxu0 %v1198_v1 }
  0x70   :  { %956 = vmatpush3.bf16.msra.mxu0 %v1057_v23 }
  0x71   :  { %957 = vmatprep.subr.bf16.mxu0 %v1198_v1 }
  0x74   :  { %958 = vmatpush3.bf16.msra.mxu0 %v1058_v24 }
  0x75   :  { %959 = vmatprep.subr.bf16.mxu0 %v1198_v1 }
  0x78   :  { %960 = vmatpush3.bf16.msra.mxu0 %v1059_v33 }
  0x79   :  { %961 = vmatprep.subr.bf16.mxu0 %v1198_v1 }
  0x7c   :  { %962 = vmatpush3.bf16.msra.mxu0 %v1060_v34 }
  0x7d   :  { %963 = vmatprep.subr.bf16.mxu0 %v1198_v1 }
  0x80   :  { %964 = vmatpush3.bf16.msra.mxu0 %v1061_v35 }
  0x81   :  { %989 = vmatprep.subr.bf16.mxu0 %v1198_v1 }
 0x136   :  { %v184_v26 = vpop.f32.mrb[0].mxu0 }
 0x137   :  { %v185_v27 = vadd.f32 %v795_v25, %v184_v26  ;;  %v927_v28 = vpop.f32.mrb[1].mxu0 }
 0x138   :  { %v187_v29 = vpop.f32.mrb[2].mxu0  ;;  %v1085_v28 = vld [vmem:[#allocation9 + $0xb8] sm:$0xff]  }
 0x139   :  { %v190_v30 = vmax.f32 %v185_v27, 0.0  ;;  %v928_v31 = vpop.f32.mrb[3].mxu0  ;;  %v1084_v27 = vld [vmem:[#allocation9 + $0xb0] sm:$0xff]   ;;  %v836_v29 = vld [vmem:[%s1402_s3 + $0x2] ss:$0 sm:$0xff]  ;;  %s1200_s3 = smov [#allocation10]  }
 0x13a   :  { %s784_s0 = sshll.u32 %s1200_s3, 4  ;;  %s785_s0 = int_to_ptr.vmem [resolvable:$true] %s784_s0 }
 0x13b   :  { %v191_v32 = vpack.c.bf16 %v190_v30, %v190_v30  ;;  %s1162_s9 = scalar_lea.vmem %s785_s0, 128  ;;  %p1167_p0 = scmp.lt.s32.totalorder %s785_s0, %s785_s0 }
 0x13c   :  { %p1163_p13 = scmp.ne.s32.totalorder %s785_s0, %s1162_s9  ;;  %p1168_p1 = scmp.lt.s32.totalorder %s1162_s9, %s1162_s9 }
 0x13d   :  { %946 = vmatmul.mubr.bf16.vlgmr.msra.gmra.mrb[0].mxu1 %v191_v32 }
 0x13e   :  { %985 = vmatprep.mubr.msk.bf16.mxu1 %vm1199_vm0, %v1198_v1  ;;  %970 = vmatpush3.bf16.msra.mxu1 %v1062_v36  ;;  %p1169_p2 = por %p1168_p1, %p1167_p0 }
 0x13f   :  { %971 = vmatprep.subr.bf16.mxu1 %v1198_v1 }
 0x140   :  { %p1170_p3 = pnand %p1169_p2, %p1163_p13 }
 0x142   :  { %972 = vmatpush3.bf16.msra.mxu1 %v1063_v37  ;;  %v846_v37 = vld [vmem:[%s1404_s5 + $0x2] ss:$0 sm:$0xff] }
 0x143   :  { %973 = vmatprep.subr.bf16.mxu1 %v1198_v1 }
 0x146   :  { %974 = vmatpush3.bf16.msra.mxu1 %v1064_v38 }
 0x147   :  { %975 = vmatprep.subr.bf16.mxu1 %v1198_v1 }
 0x14a   :  { %976 = vmatpush3.bf16.msra.mxu1 %v1065_v39 }
 0x14b   :  { %977 = vmatprep.subr.bf16.mxu1 %v1198_v1 }
 0x14e   :  { %978 = vmatpush3.bf16.msra.mxu1 %v1066_v40 }
 0x14f   :  { %979 = vmatprep.subr.bf16.mxu1 %v1198_v1 }
 0x152   :  { %980 = vmatpush3.bf16.msra.mxu1 %v1067_v41  ;;  %v774_v41 = vstv %s834_s28 }
 0x153   :  { %981 = vmatprep.subr.bf16.mxu1 %v1198_v1 }
 0x156   :  { %982 = vmatpush3.bf16.msra.mxu1 %v1068_v54 }
 0x157   :  { %983 = vmatprep.subr.bf16.mxu1 %v1198_v1 }
 0x15a   :  { %984 = vmatpush3.bf16.msra.mxu1 %v1069_v55 }
 0x15b   :  { %1009 = vmatprep.subr.bf16.mxu1 %v1198_v1 }
 0x210   :  { %v297_v43 = vpop.f32.mrb[0].mxu1 }
 0x211   :  { %v298_v44 = vadd.f32 %v804_v42, %v297_v43  ;;  %v947_v45 = vpop.f32.mrb[1].mxu1 }
 0x212   :  { %v300_v47 = vpop.f32.mrb[2].mxu1 }
 0x213   :  { %v303_v48 = vsub.f32 %v298_v44, %v1307_v9  ;;  %v948_v49 = vpop.f32.mrb[3].mxu1 }
 0x215   :  { %v305_v50 = vmul.f32 %v304_v46, %v303_v48 }
 0x217   :  { %v306_v51 = vadd.f32 %v305_v50, %v1307_v9  ;;  %v1078_v9 = vld [vmem:[#allocation9 + $0x80] sm:$0xff]  }
 0x219   :  { %v1349_v52 = vmax.f32 %v306_v51, 0.0 }
 0x21b   :  { %v309_v53 = vpack.c.bf16 %v1349_v52, %v1349_v52 }
 0x21d   :  { %966 = vmatmul.mubr.bf16.vlgmr.msra.gmra.mrb[4].mxu0 %v309_v53 }
 0x21e   :  { %1005 = vmatprep.mubr.msk.bf16.mxu0 %vm1199_vm0, %v1198_v1  ;;  %990 = vmatpush3.bf16.msra.mxu0 %v1070_v56 }
 0x21f   :  { %991 = vmatprep.subr.bf16.mxu0 %v1198_v1 }
 0x222   :  { %992 = vmatpush3.bf16.msra.mxu0 %v1071_v57 }
 0x223   :  { %993 = vmatprep.subr.bf16.mxu0 %v1198_v1 }
 0x226   :  { %994 = vmatpush3.bf16.msra.mxu0 %v1072_v58 }
 0x227   :  { %995 = vmatprep.subr.bf16.mxu0 %v1198_v1 }
 0x22a   :  { %996 = vmatpush3.bf16.msra.mxu0 %v1073_v59 }
 0x22b   :  { %997 = vmatprep.subr.bf16.mxu0 %v1198_v1 }
 0x22e   :  { %998 = vmatpush3.bf16.msra.mxu0 %v1074_v60 }
 0x22f   :  { %999 = vmatprep.subr.bf16.mxu0 %v1198_v1 }
 0x232   :  { %1000 = vmatpush3.bf16.msra.mxu0 %v1075_v6 }
 0x233   :  { %1001 = vmatprep.subr.bf16.mxu0 %v1198_v1 }
 0x236   :  { %1002 = vmatpush3.bf16.msra.mxu0 %v1076_v7 }
 0x237   :  { %1003 = vmatprep.subr.bf16.mxu0 %v1198_v1 }
 0x23a   :  { %1004 = vmatpush3.bf16.msra.mxu0 %v1077_v8 }
 0x2f0   :  { %v417_v62 = vpop.f32.mrb[4].mxu0 }
 0x2f1   :  { %v418_v63 = vadd.f32 %v815_v61, %v417_v62  ;;  %v967_v0 = vpop.f32.mrb[5].mxu0 }
 0x2f2   :  { %v420_v2 = vpop.f32.mrb[6].mxu0 }
 0x2f3   :  { %v423_v3 = vmax.f32 %v418_v63, 0.0  ;;  %v968_v4 = vpop.f32.mrb[7].mxu0 }
 0x2f5   :  { %v424_v5 = vpack.c.bf16 %v423_v3, %v423_v3 }
 0x2f7   :  { %986 = vmatmul.mubr.bf16.vlgmr.msra.gmra.mrb[4].mxu1 %v424_v5 }
 0x2f8   :  { %1025 = vmatprep.mubr.msk.bf16.mxu1 %vm1199_vm0, %v1198_v1  ;;  %1010 = vmatpush3.bf16.msra.mxu1 %v1078_v9 }
 0x2f9   :  { %1011 = vmatprep.subr.bf16.mxu1 %v1198_v1 }
 0x2fc   :  { %1012 = vmatpush3.bf16.msra.mxu1 %v1079_v10 }
 0x2fd   :  { %1013 = vmatprep.subr.bf16.mxu1 %v1198_v1 }
 0x300   :  { %1014 = vmatpush3.bf16.msra.mxu1 %v1080_v11 }
 0x301   :  { %1015 = vmatprep.subr.bf16.mxu1 %v1198_v1 }
 0x304   :  { %1016 = vmatpush3.bf16.msra.mxu1 %v1081_v12 }
 0x305   :  { %1017 = vmatprep.subr.bf16.mxu1 %v1198_v1 }
 0x308   :  { %1018 = vmatpush3.bf16.msra.mxu1 %v1082_v13 }
 0x309   :  { %1019 = vmatprep.subr.bf16.mxu1 %v1198_v1 }
 0x30c   :  { %1020 = vmatpush3.bf16.msra.mxu1 %v1083_v14 }
 0x30d   :  { %1021 = vmatprep.subr.bf16.mxu1 %v1198_v1 }
 0x310   :  { %1022 = vmatpush3.bf16.msra.mxu1 %v1084_v27 }
 0x311   :  { %1023 = vmatprep.subr.bf16.mxu1 %v1198_v1 }
 0x314   :  { %1024 = vmatpush3.bf16.msra.mxu1 %v1085_v28 }
 0x3ca   :  { %v532_v16 = vpop.f32.mrb[4].mxu1 }
 0x3cb   :  { %v533_v17 = vadd.f32 %v825_v15, %v532_v16  ;;  %v987_v18 = vpop.f32.mrb[5].mxu1 }
 0x3cc   :  { %v535_v20 = vpop.f32.mrb[6].mxu1 }
 0x3cd   :  { %v538_v21 = vsub.f32 %v533_v17, %v1349_v52  ;;  %v988_v22 = vpop.f32.mrb[7].mxu1 }
 0x3cf   :  { %v540_v23 = vmul.f32 %v539_v19, %v538_v21 }
 0x3d1   :  { %v541_v24 = vadd.f32 %v540_v23, %v1349_v52 }
 0x3d3   :  { %v543_v25 = vmax.f32 %v541_v24, 0.0 }
 0x3d5   :  { %v544_v26 = vpack.c.bf16 %v543_v25, %v543_v25 }
 0x3d7   :  { %1006 = vmatmul.mubr.bf16.vlgmr.msra.gmra.mrb[8].mxu0 %v544_v26 }
 0x4aa   :  { %v652_v30 = vpop.f32.mrb[8].mxu0 }
 0x4ab   :  { %v653_v31 = vadd.f32 %v836_v29, %v652_v30  ;;  %v1007_v32 = vpop.f32.mrb[9].mxu0 }
 0x4ac   :  { %v655_v33 = vpop.f32.mrb[10].mxu0 }
 0x4ad   :  { %v658_v34 = vmax.f32 %v653_v31, 0.0  ;;  %v1008_v35 = vpop.f32.mrb[11].mxu0 }
 0x4af   :  { %v659_v36 = vpack.c.bf16 %v658_v34, %v658_v34 }
 0x4b1   :  { %1026 = vmatmul.mubr.bf16.vlgmr.msra.gmra.mrb[8].mxu1 %v659_v36 }
 0x584   :  { %v767_v1 = vpop.f32.mrb[8].mxu1 }
 0x585   :  { %v768_v38 = vadd.f32 %v846_v37, %v767_v1  ;;  %v1027_v39 = vpop.f32.mrb[9].mxu1 }
 0x586   :  { %v770_v40 = vpop.f32.mrb[10].mxu1 }
 0x587   :  { %v773_v42 = vsub.f32 %v768_v38, %v543_v25  ;;  %v1028_v43 = vpop.f32.mrb[11].mxu1 }
 0x589   :  { %v775_v44 = vmul.f32 %v774_v41, %v773_v42 }
 0x58b   :  { %v776_v45 = vadd.f32 %v775_v44, %v543_v25 }
 0x58d   :  { %777 = vst [vmem:[#allocation10] sm:$0xff] %v776_v45 }
 0x58e   :  { %1173 = shalt.err (!%p1170_p3)
}
 0x58f   :  { %s1174_s11 = scalar_lea.hbm %s1405_s6, 128 }
 0x590   :  { %p1175_p4 = scmp.ne.s32.totalorder %s1405_s6, %s1174_s11  ;;  %p1178_p5 = scmp.lt.u32.totalorder %s1174_s11, %s1405_s6 }
 0x592   :  { %p1180_p6 = pnand %p1178_p5, %p1175_p4 }
 0x594   :  { %1183 = shalt.err (!%p1180_p6)
}
 0x595   :  { %787 = dma.vmem_to_hbm [thread:$0]  %s785_s0, 128, %s1405_s6, [#allocation4]  }
 0x596   :  { %1190 = dma.done.wait [#allocation4], 128  }
 0x597   :  { %1191 = vsyncadd [#allocation4], 4294967168 }
 0x598   :  { %791 = vsyncpa [#allocation3], 1 }
 0x599   :  { %792 = vsyncpa [#allocation8], 1 }
 0x59a   :  { %793 = vsyncpa [#allocation4], 1 }
 0x59b   :  { %794 = vsyncpa [#allocation5], 1 }

</bundles_post_ra>
